<compile_context>
chip_gen: v5e
topology: v5e:2x2
jax: 0.10.0
libtpu: 0.0.40
codegen_flags: <defaults>
</compile_context>

<pallas_src>
import functools

import jax
import jax.numpy as jnp
from jax.experimental import pallas as pl
from jax.experimental.pallas import tpu as pltpu


# ---------------------------------------------------------------------------
# Fused CosFace kernel: normalize + cosine matmul + margin + scale, per C tile
# ---------------------------------------------------------------------------
def _cosface_kernel(x_ref, lab_ref, wt_ref, out_ref, *, s, m, normalize_x):
    j = pl.program_id(0)

    x = x_ref[...]                                      # (B, D)  f32
    wt = wt_ref[...]                                    # (D, TC) f32 or bf16

    # L2-normalize x with rsqrt (EUP) + VPU multiplies; no divides.
    # eps on the sum-of-squares (1e-24) == reference's 1e-12 clamp on the norm.
    if normalize_x:
        x_inv = jax.lax.rsqrt(
            jnp.maximum(jnp.sum(x * x, axis=1, keepdims=True), 1e-24))
        xn = x * x_inv                                  # (B, D)
    else:
        xn = x

    # Per-class inverse norm as a (1, TC) lane-layout row (sublane reduce of the
    # (D, TC) tile).  The normalized weight tile is NOT materialized; the scale
    # is applied to the (B, TC) matmul result instead.
    wt32 = wt.astype(jnp.float32)
    w_inv_row = jax.lax.rsqrt(
        jnp.maximum(jnp.sum(wt32 * wt32, axis=0, keepdims=True), 1e-24))

    # Whole-batch MXU matmul on the raw streamed tile: (B, D) @ (D, TC) -> (B, TC)
    cos = jnp.dot(xn.astype(wt.dtype), wt,
                  preferred_element_type=jnp.float32) * w_inv_row

    # Fused margin + scale as one select; s*m folded to a Python constant.
    tc = out_ref.shape[1]
    col = j * tc + jax.lax.broadcasted_iota(jnp.int32, cos.shape, 1)
    s_cos = s * cos
    out_ref[...] = jnp.where(col == lab_ref[...], s_cos - (s * m),
                             s_cos).astype(out_ref.dtype)


# ---------------------------------------------------------------------------
# Wrapper: tile-size / VMEM-budget selection + pallas_call
# ---------------------------------------------------------------------------
_VMEM_TILE_BUDGET = 40 * 1024 * 1024   # conservative: fits v7x (64 MiB physical)


def _pick_tile_c(B, D, C, w_bytes):
    resident = 2 * B * D * 4 + 2 * B * 4            # x + labels (double-buffered)
    for cand in (2048, 1024, 512, 256, 128):
        if C % cand:
            continue
        need = 2 * D * cand * w_bytes + 2 * B * cand * 4 + resident
        if need <= _VMEM_TILE_BUDGET:
            return cand
    return C                                        # tiny / odd C: one full tile


def cosface_forward_pallas(weight_t, x, label, *, s=64.0, m=0.35, tile_c=None,
                           prenormalize_x=False):
    """weight_t: (D, C) transposed classifier weight.

    Store the parameter persistently in this layout (transpose once at init);
    do NOT transpose per call -- that would double the dominant HBM traffic.
    """
    B, D = x.shape
    D2, C = weight_t.shape
    assert D == D2
    w_bytes = jnp.dtype(weight_t.dtype).itemsize
    if tile_c is None:
        tile_c = _pick_tile_c(B, D, C, w_bytes)
    assert C % tile_c == 0
    assert tile_c == C or tile_c % 128 == 0          # lane-dense output tiles

    if prenormalize_x:
        # Hoist the O(B*D) normalization out of the grid loop (useful at large
        # B on v5e/v6e; one tiny XLA op, megacore-safe on v7x).
        x = x * jax.lax.rsqrt(
            jnp.maximum(jnp.sum(x * x, axis=1, keepdims=True), 1e-24))
    lab2 = label.astype(jnp.int32).reshape(B, 1)

    kernel = functools.partial(_cosface_kernel, s=float(s), m=float(m),
                               normalize_x=not prenormalize_x)

    # Explicit scoped-VMEM limit from the double-buffered working set + headroom.
    need = (2 * D * tile_c * w_bytes + 2 * B * tile_c * 4
            + 2 * B * D * 4 + 2 * B * 4)
    vmem_limit = int(min(max(need + (4 << 20), 32 << 20), 48 << 20))

    cost = pl.CostEstimate(
        flops=2 * B * D * C,
        transcendentals=B + C,
        bytes_accessed=D * C * w_bytes + B * C * 4 + B * D * 4 + B * 4)

    return pl.pallas_call(
        kernel,
        out_shape=jax.ShapeDtypeStruct((B, C), jnp.float32),
        grid_spec=pltpu.PrefetchScalarGridSpec(
            num_scalar_prefetch=0,
            grid=(C // tile_c,),
            in_specs=[
                pl.BlockSpec((B, D), lambda j: (0, 0)),        # x (resident)
                pl.BlockSpec((B, 1), lambda j: (0, 0)),        # labels (resident)
                pl.BlockSpec((D, tile_c), lambda j: (0, j)),   # weight.T tile
            ],
            out_specs=pl.BlockSpec((B, tile_c), lambda j: (0, j)),
        ),
        compiler_params=pltpu.CompilerParams(
            dimension_semantics=("parallel",),
            vmem_limit_bytes=vmem_limit),
        cost_estimate=cost,
    )(x, lab2, weight_t)


@functools.partial(jax.jit, static_argnames=("s", "m", "tile_c", "prenormalize_x"))
def cosface_forward(weight_t, x, label, *, s=64.0, m=0.35, tile_c=None,
                    prenormalize_x=False):
    return cosface_forward_pallas(weight_t, x, label, s=s, m=m, tile_c=tile_c,
                                  prenormalize_x=prenormalize_x)


# ---------------------------------------------------------------------------
# Pure-JAX reference (matches the PyTorch module; weight in (C, D) layout)
# ---------------------------------------------------------------------------
def reference_forward(weight, x, label, s=64.0, m=0.35):
    xn = x / jnp.maximum(jnp.linalg.norm(x, axis=1, keepdims=True), 1e-12)
    wn = weight / jnp.maximum(
        jnp.linalg.norm(weight, axis=1, keepdims=True), 1e-12)
    cosine = jnp.matmul(xn, wn.T, precision=jax.lax.Precision.HIGHEST)
    one_hot = jax.nn.one_hot(label, weight.shape[0], dtype=cosine.dtype)
    return s * (one_hot * (cosine - m) + (1.0 - one_hot) * cosine)


if __name__ == "__main__":
    B = 8        # batch (sublane-aligned)
    D = 128      # in_features
    C = 512      # out_features
    s_param = 64.0
    m_param = 0.35

    key = jax.random.PRNGKey(0)
    kw, kx, klab = jax.random.split(key, 3)

    # xavier_uniform_ init for weight (PyTorch (C, D) layout), like the module.
    bound = (6.0 / (C + D)) ** 0.5
    weight = jax.random.uniform(kw, (C, D), jnp.float32, -bound, bound)
    x = jax.random.normal(kx, (B, D), jnp.float32)
    label = jax.random.randint(klab, (B,), 0, C, jnp.int32)

    # One-time layout change: store the classifier weight transposed (D, C) so
    # the kernel streams standard (K, N) MXU tiles.  In production do this once
    # at parameter-init time, not per forward call.
    weight_t = jnp.asarray(weight.T)

    out = cosface_forward(weight_t, x, label, s=s_param, m=m_param)
    jax.block_until_ready(out)

    ref = reference_forward(weight, x, label, s=s_param, m=m_param)
    assert out.shape == (B, C) and out.dtype == jnp.float32
    err = float(jnp.max(jnp.abs(out - ref)))
    assert bool(jnp.allclose(out, ref, atol=2e-3, rtol=2e-3)), err
    # margin really applied only at the label columns
    assert bool(jnp.allclose(ref - out, 0.0, atol=2e-3))

    # Also exercise the hoisted-x-normalization path (large-B / v5e variant).
    out2 = cosface_forward(weight_t, x, label, s=s_param, m=m_param,
                           prenormalize_x=True)
    jax.block_until_ready(out2)
    assert bool(jnp.allclose(out2, ref, atol=2e-3, rtol=2e-3))

    print("KERNEL_OK")
</pallas_src>

<mosaic_0001>
module attributes {stable_mosaic.version = 11 : i64} {
  func.func @_cosface_kernel(%arg0: i32, %arg1: memref<8x128xf32, #tpu.memory_space<vmem>>, %arg2: memref<8x1xi32, #tpu.memory_space<vmem>>, %arg3: memref<128x512xf32, #tpu.memory_space<vmem>>, %arg4: memref<8x512xf32, #tpu.memory_space<vmem>>) attributes {dimension_semantics = [#tpu.dimension_semantics<parallel>], iteration_bounds = array<i64: 1>, scalar_prefetch = 0 : i64, scratch_operands = 0 : i64, tpu.core_type = #tpu.core_type<tc>, window_params = [{pipeline_mode = #tpu.pipeline_mode<synchronous>, transform_indices = @transform_0, window_bounds = array<i64: 8, 128>}, {pipeline_mode = #tpu.pipeline_mode<synchronous>, transform_indices = @transform_1, window_bounds = array<i64: 8, 1>}, {transform_indices = @transform_2, window_bounds = array<i64: 128, 512>}, {transform_indices = @transform_3, window_bounds = array<i64: 8, 512>}]} {
    %c0 = arith.constant 0 : index
    %c0_0 = arith.constant 0 : index
    %0 = vector.load %arg1[%c0, %c0_0] : memref<8x128xf32, #tpu.memory_space<vmem>>, vector<8x128xf32>
    %c0_1 = arith.constant 0 : index
    %c0_2 = arith.constant 0 : index
    %1 = vector.load %arg3[%c0_1, %c0_2] : memref<128x512xf32, #tpu.memory_space<vmem>>, vector<128x512xf32>
    %2 = arith.mulf %0, %0 : vector<8x128xf32>
    %cst = arith.constant dense<0.000000e+00> : vector<8xf32>
    %3 = vector.multi_reduction <add>, %2, %cst [1] : vector<8x128xf32> to vector<8xf32>
    %4 = vector.shape_cast %3 : vector<8xf32> to vector<8x1xf32>
    %cst_3 = arith.constant 1.000000e-24 : f32
    %5 = vector.broadcast %cst_3 : f32 to vector<8x1xf32>
    %6 = arith.maximumf %4, %5 : vector<8x1xf32>
    %7 = math.rsqrt %6 : vector<8x1xf32>
    %8 = vector.broadcast %7 : vector<8x1xf32> to vector<8x128xf32>
    %9 = arith.mulf %0, %8 : vector<8x128xf32>
    %10 = arith.mulf %1, %1 : vector<128x512xf32>
    %cst_4 = arith.constant dense<0.000000e+00> : vector<512xf32>
    %11 = vector.multi_reduction <add>, %10, %cst_4 [0] : vector<128x512xf32> to vector<512xf32>
    %12 = vector.shape_cast %11 : vector<512xf32> to vector<1x512xf32>
    %cst_5 = arith.constant 1.000000e-24 : f32
    %13 = vector.broadcast %cst_5 : f32 to vector<1x512xf32>
    %14 = arith.maximumf %12, %13 : vector<1x512xf32>
    %15 = math.rsqrt %14 : vector<1x512xf32>
    %cst_6 = arith.constant dense<0.000000e+00> : vector<8x512xf32>
    %16 = tpu.matmul %9, %1, %cst_6 {dimension_numbers = #tpu.dot_dimension_numbers<[1], [0], [0], [1], [0, 0, 1, 1], [], []>} : vector<8x128xf32>, vector<128x512xf32>, vector<8x512xf32> -> vector<8x512xf32>
    %17 = vector.broadcast %15 : vector<1x512xf32> to vector<8x512xf32>
    %18 = arith.mulf %16, %17 : vector<8x512xf32>
    %c512_i32 = arith.constant 512 : i32
    %19 = arith.muli %arg0, %c512_i32 : i32
    %20 = tpu.iota {dimensions = array<i32: 1>} : vector<8x512xi32>
    %21 = vector.broadcast %19 : i32 to vector<8x512xi32>
    %22 = arith.addi %21, %20 : vector<8x512xi32>
    %cst_7 = arith.constant 6.400000e+01 : f32
    %23 = vector.broadcast %cst_7 : f32 to vector<8x512xf32>
    %24 = arith.mulf %23, %18 : vector<8x512xf32>
    %c0_8 = arith.constant 0 : index
    %c0_9 = arith.constant 0 : index
    %25 = vector.load %arg2[%c0_8, %c0_9] : memref<8x1xi32, #tpu.memory_space<vmem>>, vector<8x1xi32>
    %26 = vector.broadcast %25 : vector<8x1xi32> to vector<8x512xi32>
    %27 = arith.cmpi eq, %22, %26 : vector<8x512xi32>
    %cst_10 = arith.constant 2.240000e+01 : f32
    %28 = vector.broadcast %cst_10 : f32 to vector<8x512xf32>
    %29 = arith.subf %24, %28 : vector<8x512xf32>
    %30 = arith.select %27, %29, %24 : vector<8x512xi1>, vector<8x512xf32>
    %c0_11 = arith.constant 0 : index
    %c0_12 = arith.constant 0 : index
    %31 = vector.load %arg4[%c0_11, %c0_12] : memref<8x512xf32, #tpu.memory_space<vmem>>, vector<8x512xf32>
    tpu.vector_store %arg4[%c0_11, %c0_12], %30 {strides = array<i32>} : memref<8x512xf32, #tpu.memory_space<vmem>>, vector<8x512xf32>,
    return
  }
  func.func @transform_0(%arg0: i32) -> (i32, i32) {
    %c0_i32 = arith.constant 0 : i32
    %c0_i32_0 = arith.constant 0 : i32
    %c0_i32_1 = arith.constant 0 : i32
    return %c0_i32, %c0_i32_0 : i32, i32
  }
  func.func @transform_1(%arg0: i32) -> (i32, i32) {
    %c0_i32 = arith.constant 0 : i32
    %c0_i32_0 = arith.constant 0 : i32
    %c0_i32_1 = arith.constant 0 : i32
    return %c0_i32, %c0_i32_0 : i32, i32
  }
  func.func @transform_2(%arg0: i32) -> (i32, i32) {
    %c0_i32 = arith.constant 0 : i32
    %c0_i32_0 = arith.constant 0 : i32
    return %c0_i32, %arg0 : i32, i32
  }
  func.func @transform_3(%arg0: i32) -> (i32, i32) {
    %c0_i32 = arith.constant 0 : i32
    %c0_i32_0 = arith.constant 0 : i32
    return %c0_i32, %arg0 : i32, i32
  }
}

</mosaic_0001>

<bundles_post_ra>
// kernel: cosface_forward.1
= control target key start
LH: loop header
LB: loop body
LE: loop exit
PB: predicated region body
PF: predicated region fallthrough
CT: control target
= control target key end

     0   :  { %8 = vsyncpa [#allocation3], 0  ;;  %s809_s0 = inlined_call_operand.vmem [shape: f32[8,128], index: 0, kind: input, shape index: {}]   ;;  %s810_s1 = inlined_call_operand.vmem [shape: s32[8,1], index: 1, kind: input, shape index: {}]   ;;  %s811_s2 = inlined_call_operand.hbm [shape: f32[128,512], index: 2, kind: input, shape index: {}]   ;;  %s812_s3 = inlined_call_operand.hbm [shape: f32[8,512], index: 3, kind: output, shape index: {}]  }
   0x1   :  { %9 = vsyncpa [#allocation4], 0  ;;  %s18_s14 = sshll.u32 %s811_s2, 4  ;;  %s511_s15 = smov [#allocation2]   ;;  %s19_s14 = int_to_ptr.hbm [resolvable:$true] %s18_s14 }
   0x2   :  { %s20_s16 = sshll.u32 %s511_s15, 4  ;;  %s512_s17 = smov 512   ;;  %s21_s16 = int_to_ptr.vmem [resolvable:$true] %s20_s16 }
   0x3   :  { %s513_s18 = smov 32  }
   0x4   :  { %26 = dma.hbm_to_vmem [thread:$0]  %s19_s14, 8192, %s21_s16, [#allocation3], %s512_s17, %s512_s17, %s513_s18  }
   0x5   :  { %507 = dma.done.wait [#allocation3], 8192  }
   0x6   :  { %508 = vsyncadd [#allocation3], 4294959104  ;;  %v542_v0 = vld [vmem:[%s809_s0] sm:$0xff]  ;;  %v546_v2 = vld [vmem:[#allocation2 + $0x1e8] sm:$0xff]  ;;  %s429_s24 = sshll.u32 %s812_s3, 4  ;;  %s430_s24 = int_to_ptr.hbm [resolvable:$true] %s429_s24 }
   0x7   :  { %829 = vst [vmem:[#allocation8_spill] sm:$0xff] %v542_v0  ;;  %v544_v1 = vld [vmem:[#allocation2 + $0x1e0] sm:$0xff]  ;;  %v96_v3 = vmul.f32 %v542_v0, %v542_v0  ;;  %323 = vmatpush.msra.mxu1 %v546_v2  ;;  %v552_v4 = vld [vmem:[#allocation2 + $0x1f0] sm:$0xff]  ;;  %v554_v5 = vld [vmem:[#allocation2 + $0x1f8] sm:$0xff] }
   0x8   :  { %830 = vst [vmem:[#allocation9_spill] sm:$0xff] %v544_v1  ;;  %303 = vmatpush.msra.mxu0 %v544_v1  ;;  %v556_v6 = vld [vmem:[#allocation2 + $0x1c0] sm:$0xff]  ;;  %343 = vmatpush.msra.mxu2 %v552_v4  ;;  %v560_v7 = vld [vmem:[#allocation2 + $0x1c8] sm:$0xff]  ;;  %v562_v8 = vld [vmem:[#allocation2 + $0x1d0] sm:$0xff] }
   0x9   :  { %831 = vst [vmem:[#allocation10_spill] sm:$0xff] %v546_v2  ;;  %363 = vmatpush.msra.mxu3 %v554_v5  ;;  %v564_v9 = vld [vmem:[#allocation2 + $0x1d8] sm:$0xff]  ;;  %97 = vadd.xlane.f32.xlu0 %v96_v3  ;;  %v567_v10 = vld [vmem:[#allocation2 + $0x1a0] sm:$0xff]  ;;  %v569_v11 = vld [vmem:[#allocation2 + $0x1a8] sm:$0xff] }
   0xa   :  { %832 = vst [vmem:[#allocation11_spill] sm:$0xff] %v552_v4  ;;  %304 = vmatpush.msra.mxu0 %v556_v6  ;;  %v571_v12 = vld [vmem:[#allocation2 + $0x1b0] sm:$0xff]  ;;  %324 = vmatpush.msra.mxu1 %v560_v7  ;;  %v575_v13 = vld [vmem:[#allocation2 + $0x1b8] sm:$0xff]  ;;  %v577_v14 = vld [vmem:[#allocation2 + $0x180] sm:$0xff] }
   0xb   :  { %833 = vst [vmem:[#allocation12_spill] sm:$0xff] %v554_v5  ;;  %344 = vmatpush.msra.mxu2 %v562_v8  ;;  %364 = vmatpush.msra.mxu3 %v564_v9  ;;  %v581_v15 = vld [vmem:[#allocation2 + $0x188] sm:$0xff]  ;;  %v583_v16 = vld [vmem:[#allocation2 + $0x190] sm:$0xff]  ;;  %v587_v17 = vld [vmem:[#allocation2 + $0x198] sm:$0xff]  ;;  %v686_v4 = vmul.f32 %v577_v14, %v577_v14 }
   0xc   :  { %834 = vst [vmem:[#allocation13_spill] sm:$0xff] %v556_v6  ;;  %305 = vmatpush.msra.mxu0 %v567_v10  ;;  %325 = vmatpush.msra.mxu1 %v569_v11  ;;  %v589_v18 = vld [vmem:[#allocation2 + $0x160] sm:$0xff]  ;;  %v593_v19 = vld [vmem:[#allocation2 + $0x168] sm:$0xff]  ;;  %v595_v20 = vld [vmem:[#allocation2 + $0x170] sm:$0xff] }
   0xd   :  { %835 = vst [vmem:[#allocation14_spill] sm:$0xff] %v560_v7  ;;  %345 = vmatpush.msra.mxu2 %v571_v12  ;;  %365 = vmatpush.msra.mxu3 %v575_v13  ;;  %v599_v21 = vld [vmem:[#allocation2 + $0x178] sm:$0xff]  ;;  %v606_v22 = vld [vmem:[#allocation2 + $0x140] sm:$0xff]  ;;  %v608_v23 = vld [vmem:[#allocation2 + $0x148] sm:$0xff] }
   0xe   :  { %836 = vst [vmem:[#allocation15_spill] sm:$0xff] %v562_v8  ;;  %306 = vmatpush.msra.mxu0 %v577_v14  ;;  %326 = vmatpush.msra.mxu1 %v581_v15  ;;  %v610_v24 = vld [vmem:[#allocation2 + $0x150] sm:$0xff]  ;;  %v614_v25 = vld [vmem:[#allocation2 + $0x158] sm:$0xff]  ;;  %v618_v26 = vld [vmem:[#allocation2 + $0x120] sm:$0xff] }
   0xf   :  { %837 = vst [vmem:[#allocation16_spill] sm:$0xff] %v564_v9  ;;  %346 = vmatpush.msra.mxu2 %v583_v16  ;;  %366 = vmatpush.msra.mxu3 %v587_v17  ;;  %v620_v27 = vld [vmem:[#allocation2 + $0x128] sm:$0xff]  ;;  %v622_v28 = vld [vmem:[#allocation2 + $0x130] sm:$0xff]  ;;  %v626_v29 = vld [vmem:[#allocation2 + $0x138] sm:$0xff]  ;;  %v690_v9 = vmul.f32 %v589_v18, %v589_v18 }
  0x10   :  { %838 = vst [vmem:[#allocation17_spill] sm:$0xff] %v567_v10  ;;  %307 = vmatpush.msra.mxu0 %v589_v18  ;;  %327 = vmatpush.msra.mxu1 %v593_v19  ;;  %v630_v30 = vld [vmem:[#allocation2 + $0x100] sm:$0xff]  ;;  %v632_v31 = vld [vmem:[#allocation2 + $0x108] sm:$0xff]  ;;  %v634_v32 = vld [vmem:[#allocation2 + $0x110] sm:$0xff] }
  0x11   :  { %839 = vst [vmem:[#allocation18_spill] sm:$0xff] %v569_v11  ;;  %347 = vmatpush.msra.mxu2 %v595_v20  ;;  %367 = vmatpush.msra.mxu3 %v599_v21  ;;  %v638_v33 = vld [vmem:[#allocation2 + $0x118] sm:$0xff]  ;;  %v642_v34 = vld [vmem:[#allocation2 + $0xe0] sm:$0xff]  ;;  %v644_v35 = vld [vmem:[#allocation2 + $0xe8] sm:$0xff] }
  0x12   :  { %840 = vst [vmem:[#allocation19_spill] sm:$0xff] %v571_v12  ;;  %308 = vmatpush.msra.mxu0 %v606_v22  ;;  %328 = vmatpush.msra.mxu1 %v608_v23  ;;  %v646_v36 = vld [vmem:[#allocation2 + $0xf0] sm:$0xff]  ;;  %v650_v37 = vld [vmem:[#allocation2 + $0xf8] sm:$0xff]  ;;  %v654_v38 = vld [vmem:[#allocation2 + $0xc0] sm:$0xff] }
  0x13   :  { %841 = vst [vmem:[#allocation20_spill] sm:$0xff] %v575_v13  ;;  %348 = vmatpush.msra.mxu2 %v610_v24  ;;  %368 = vmatpush.msra.mxu3 %v614_v25  ;;  %v656_v39 = vld [vmem:[#allocation2 + $0xc8] sm:$0xff]  ;;  %v658_v40 = vld [vmem:[#allocation2 + $0xd0] sm:$0xff]  ;;  %v662_v41 = vld [vmem:[#allocation2 + $0xd8] sm:$0xff] }
  0x14   :  { %842 = vst [vmem:[#allocation21_spill] sm:$0xff] %v581_v15  ;;  %309 = vmatpush.msra.mxu0 %v618_v26  ;;  %329 = vmatpush.msra.mxu1 %v620_v27  ;;  %v52_v42 = vld [vmem:[#allocation2 + $0xa0] sm:$0xff]  ;;  %v666_v43 = vld [vmem:[#allocation2 + $0xa8] sm:$0xff]  ;;  %v668_v44 = vld [vmem:[#allocation2 + $0xb0] sm:$0xff] }
  0x15   :  { %843 = vst [vmem:[#allocation22_spill] sm:$0xff] %v583_v16  ;;  %349 = vmatpush.msra.mxu2 %v622_v28  ;;  %369 = vmatpush.msra.mxu3 %v626_v29  ;;  %v671_v45 = vld [vmem:[#allocation2 + $0xb8] sm:$0xff]  ;;  %v48_v46 = vld [vmem:[#allocation2 + $0x80] sm:$0xff]  ;;  %v675_v47 = vld [vmem:[#allocation2 + $0x88] sm:$0xff]  ;;  %v131_v8 = vmul.f32 %v52_v42, %v52_v42 }
  0x16   :  { %844 = vst [vmem:[#allocation23_spill] sm:$0xff] %v587_v17  ;;  %310 = vmatpush.msra.mxu0 %v630_v30  ;;  %330 = vmatpush.msra.mxu1 %v632_v31  ;;  %v677_v48 = vld [vmem:[#allocation2 + $0x90] sm:$0xff]  ;;  %v680_v49 = vld [vmem:[#allocation2 + $0x98] sm:$0xff]  ;;  %v44_v50 = vld [vmem:[#allocation2 + $0x60] sm:$0xff]  ;;  %v127_v13 = vmul.f32 %v48_v46, %v48_v46 }
  0x17   :  { %350 = vmatpush.msra.mxu2 %v634_v32  ;;  %370 = vmatpush.msra.mxu3 %v638_v33  ;;  %v45_v51 = vld [vmem:[#allocation2 + $0x68] sm:$0xff]  ;;  %v46_v52 = vld [vmem:[#allocation2 + $0x70] sm:$0xff]  ;;  %v47_v53 = vld [vmem:[#allocation2 + $0x78] sm:$0xff]  ;;  %845 = vst [vmem:[#allocation24_spill] sm:$0xff] %v686_v4  ;;  %v123_v12 = vmul.f32 %v44_v50, %v44_v50 }
  0x18   :  { %311 = vmatpush.msra.mxu0 %v642_v34  ;;  %331 = vmatpush.msra.mxu1 %v644_v35  ;;  %v40_v54 = vld [vmem:[#allocation2 + $0x40] sm:$0xff]  ;;  %v41_v55 = vld [vmem:[#allocation2 + $0x48] sm:$0xff]  ;;  %v42_v56 = vld [vmem:[#allocation2 + $0x50] sm:$0xff]  ;;  %846 = vst [vmem:[#allocation25_spill] sm:$0xff] %v690_v9 }
  0x19   :  { %351 = vmatpush.msra.mxu2 %v646_v36  ;;  %371 = vmatpush.msra.mxu3 %v650_v37  ;;  %v43_v57 = vld [vmem:[#allocation2 + $0x58] sm:$0xff]  ;;  %v36_v58 = vld [vmem:[#allocation2 + $0x20] sm:$0xff]  ;;  %v37_v59 = vld [vmem:[#allocation2 + $0x28] sm:$0xff]  ;;  %v119_v17 = vmul.f32 %v40_v54, %v40_v54  ;;  %v120_v16 = vmul.f32 %v41_v55, %v41_v55  ;;  %v121_v2 = vmul.f32 %v42_v56, %v42_v56 }
  0x1a   :  { %312 = vmatpush.msra.mxu0 %v654_v38  ;;  %332 = vmatpush.msra.mxu1 %v656_v39  ;;  %v38_v60 = vld [vmem:[#allocation2 + $0x30] sm:$0xff]  ;;  %v39_v61 = vld [vmem:[#allocation2 + $0x38] sm:$0xff]  ;;  %v32_v62 = vld [vmem:[#allocation2] sm:$0xff]  ;;  %v122_v7 = vmul.f32 %v43_v57, %v43_v57  ;;  %v115_v11 = vmul.f32 %v36_v58, %v36_v58  ;;  %v116_v15 = vmul.f32 %v37_v59, %v37_v59 }
  0x1b   :  { %352 = vmatpush.msra.mxu2 %v658_v40  ;;  %372 = vmatpush.msra.mxu3 %v662_v41  ;;  %v33_v63 = vld [vmem:[#allocation2 + $0x8] sm:$0xff]  ;;  %v34_v3 = vld [vmem:[#allocation2 + $0x10] sm:$0xff]  ;;  %v35_v5 = vld [vmem:[#allocation2 + $0x18] sm:$0xff]  ;;  %v117_v1 = vmul.f32 %v38_v60, %v38_v60  ;;  %v118_v6 = vmul.f32 %v39_v61, %v39_v61  ;;  %v111_v0 = vmul.f32 %v32_v62, %v32_v62 }
  0x1c   :  { %313 = vmatpush.msra.mxu0 %v52_v42  ;;  %333 = vmatpush.msra.mxu1 %v666_v43  ;;  %v112_v14 = vmul.f32 %v33_v63, %v33_v63  ;;  %v113_v4 = vmul.f32 %v34_v3, %v34_v3  ;;  %v114_v10 = vmul.f32 %v35_v5, %v35_v5  ;;  %v402_v18 = vld [vmem:[%s810_s1] sm:$0xff]  ;;  %s515_s1 = smov [#allocation5]  }
  0x1d   :  { %353 = vmatpush.msra.mxu2 %v668_v44  ;;  %373 = vmatpush.msra.mxu3 %v671_v45  ;;  %v124_v42 = vmul.f32 %v45_v51, %v45_v51  ;;  %s427_s21 = sshll.u32 %s515_s1, 4  ;;  %s428_s21 = int_to_ptr.vmem [resolvable:$true] %s427_s21 }
  0x1e   :  { %314 = vmatpush.msra.mxu0 %v48_v46  ;;  %334 = vmatpush.msra.mxu1 %v675_v47  ;;  %v125_v46 = vmul.f32 %v46_v52, %v46_v52 }
  0x1f   :  { %354 = vmatpush.msra.mxu2 %v677_v48  ;;  %374 = vmatpush.msra.mxu3 %v680_v49 }
  0x20   :  { %315 = vmatpush.msra.mxu0 %v44_v50  ;;  %335 = vmatpush.msra.mxu1 %v45_v51  ;;  %v126_v50 = vmul.f32 %v47_v53, %v47_v53  ;;  %v130_v51 = vmul.f32 %v680_v49, %v680_v49  ;;  %v137_v49 = vmul.f32 %v658_v40, %v658_v40 }
  0x21   :  { %355 = vmatpush.msra.mxu2 %v46_v52  ;;  %375 = vmatpush.msra.mxu3 %v47_v53  ;;  %v142_v40 = vmul.f32 %v650_v37, %v650_v37 }
  0x22   :  { %316 = vmatpush.msra.mxu0 %v40_v54  ;;  %336 = vmatpush.msra.mxu1 %v41_v55  ;;  %v175_v54 = vadd.f32 %v115_v11, %v111_v0  ;;  %v196_v55 = vadd.f32 %v116_v15, %v112_v14 }
  0x23   :  { %356 = vmatpush.msra.mxu2 %v42_v56  ;;  %376 = vmatpush.msra.mxu3 %v43_v57  ;;  %v217_v56 = vadd.f32 %v117_v1, %v113_v4  ;;  %v238_v57 = vadd.f32 %v118_v6, %v114_v10  ;;  %v132_v1 = vmul.f32 %v666_v43, %v666_v43 }
  0x24   :  { %317 = vmatpush.msra.mxu0 %v36_v58  ;;  %337 = vmatpush.msra.mxu1 %v37_v59  ;;  %v514_v58 = vmov 0   ;;  %v176_v52 = vadd.f32 %v175_v54, %v119_v17  ;;  %v197_v53 = vadd.f32 %v196_v55, %v120_v16  ;;  %v133_v4 = vmul.f32 %v668_v44, %v668_v44 }
  0x25   :  { %357 = vmatpush.msra.mxu2 %v38_v60  ;;  %377 = vmatpush.msra.mxu3 %v39_v61  ;;  %v128_v60 = vmul.f32 %v675_v47, %v675_v47  ;;  %v218_v0 = vadd.f32 %v217_v56, %v121_v2  ;;  %v239_v11 = vadd.f32 %v238_v57, %v122_v7 }
  0x26   :  { %318 = vmatpush.msra.mxu0 %v32_v62  ;;  %338 = vmatpush.msra.mxu1 %v33_v63  ;;  %v134_v6 = vmul.f32 %v671_v45, %v671_v45  ;;  %v198_v10 = vadd.f32 %v197_v53, %v124_v42  ;;  %v712_v16 = vmul.f32 %v593_v19, %v593_v19 }
  0x27   :  { %358 = vmatpush.msra.mxu2 %v34_v3  ;;  %378 = vmatpush.msra.mxu3 %v35_v5  ;;  %v129_v5 = vmul.f32 %v677_v48, %v677_v48  ;;  %v219_v15 = vadd.f32 %v218_v0, %v125_v46  ;;  %v240_v47 = vadd.f32 %v239_v11, %v126_v50 }
  0x28   :  { %448 = vset.pattern.permute.xlu0 %v514_v58  ;;  %v151_v2 = vmul.f32 %v606_v22, %v606_v22  ;;  %v135_v7 = vmul.f32 %v654_v38, %v654_v38  ;;  %v136_v17 = vmul.f32 %v656_v39, %v656_v39  ;;  %v199_v44 = vadd.f32 %v198_v10, %v128_v60 }
  0x29   :  { %404 = vperm.xlu0 %448, %v402_v18   ;;  %v220_v45 = vadd.f32 %v219_v15, %v129_v5  ;;  %v139_v48 = vmul.f32 %v642_v34, %v642_v34  ;;  %v140_v19 = vmul.f32 %v644_v35, %v644_v35  ;;  %v138_v22 = vmul.f32 %v662_v41, %v662_v41 }
  0x2a   :  { %v200_v61 = vadd.f32 %v199_v44, %v132_v1  ;;  %v147_v63 = vmul.f32 %v618_v26, %v618_v26  ;;  %v143_v34 = vmul.f32 %v630_v30, %v630_v30  ;;  %v141_v35 = vmul.f32 %v646_v36, %v646_v36 }
  0x2b   :  { %v221_v62 = vadd.f32 %v220_v45, %v133_v4  ;;  %v145_v18 = vmul.f32 %v634_v32, %v634_v32  ;;  %v146_v26 = vmul.f32 %v638_v33, %v638_v33  ;;  %v148_v36 = vmul.f32 %v620_v27, %v620_v27  ;;  %v850_v45 = vld [vmem:[#allocation13_spill] sm:$0xff] }
  0x2c   :  { %v201_v14 = vadd.f32 %v200_v61, %v136_v17  ;;  %v149_v54 = vmul.f32 %v622_v28, %v622_v28  ;;  %v152_v33 = vmul.f32 %v608_v23, %v608_v23  ;;  %v153_v60 = vmul.f32 %v610_v24, %v610_v24 }
  0x2d   :  { %v222_v30 = vadd.f32 %v221_v62, %v137_v49  ;;  %v154_v27 = vmul.f32 %v614_v25, %v614_v25  ;;  %v157_v53 = vmul.f32 %v595_v20, %v595_v20  ;;  %v158_v23 = vmul.f32 %v599_v21, %v599_v21  ;;  %v854_v62 = vld [vmem:[#allocation18_spill] sm:$0xff] }
  0x2e   :  { %v202_v50 = vadd.f32 %v201_v14, %v140_v19 }
  0x2f   :  { %v223_v55 = vadd.f32 %v222_v30, %v141_v35  ;;  %v856_v35 = vld [vmem:[#allocation10_spill] sm:$0xff] }
  0x31   :  { %v224_v5 = vadd.f32 %v223_v55, %v145_v18 }
  0x33   :  { %v225_v0 = vadd.f32 %v224_v5, %v149_v54  ;;  %v862_v54 = vld [vmem:[#allocation16_spill] sm:$0xff] }
  0x35   :  { %v226_v25 = vadd.f32 %v225_v0, %v153_v60 }
  0x37   :  { %v227_v17 = vadd.f32 %v226_v25, %v157_v53 }
  0x7c   :  { %v98_v9 = vpop.xlane.xlu0 %97 }
  0x7d   :  { %v695_v59 = vmax.f32 %v98_v9, 1e-24  ;;  %v177_v9 = vadd.f32 %v176_v52, %v123_v12  ;;  %v241_v12 = vadd.f32 %v240_v47, %v130_v51  ;;  %v848_v47 = vld [vmem:[#allocation25_spill] sm:$0xff] }
  0x7f   :  { %449 = vrsqrt.f32 %v695_v59  ;;  %v178_v43 = vadd.f32 %v177_v9, %v127_v13  ;;  %v242_v39 = vadd.f32 %v241_v12, %v134_v6  ;;  %vm106_vm1 = vweird.f32 %v695_v59  ;;  %v847_v9 = vld [vmem:[#allocation17_spill] sm:$0xff] }
  0x80   :  { %v163_v10 = vmul.f32 %v847_v9, %v847_v9 }
  0x81   :  { %v179_v38 = vadd.f32 %v178_v43, %v131_v8  ;;  %v144_v8 = vmul.f32 %v632_v31, %v632_v31  ;;  %v243_v42 = vadd.f32 %v242_v39, %v138_v22  ;;  %v150_v31 = vmul.f32 %v626_v29, %v626_v29  ;;  %v849_v43 = vld [vmem:[#allocation8_spill] sm:$0xff] }
  0x82   :  { %v164_v39 = vmul.f32 %v854_v62, %v854_v62 }
  0x83   :  { %v180_v41 = vadd.f32 %v179_v38, %v135_v7  ;;  %v244_v56 = vadd.f32 %v243_v42, %v142_v40  ;;  %v203_v58 = vadd.f32 %v202_v50, %v144_v8  ;;  %v172_v40 = vmul.f32 %v856_v35, %v856_v35  ;;  %v860_v42 = vld [vmem:[#allocation20_spill] sm:$0xff] }
  0x85   :  { %v450_v13 = vpop.eup %449  ;;  %v181_v37 = vadd.f32 %v180_v41, %v139_v48  ;;  %v245_v51 = vadd.f32 %v244_v56, %v146_v26  ;;  %v204_v29 = vadd.f32 %v203_v58, %v148_v36  ;;  %v852_v48 = vld [vmem:[#allocation9_spill] sm:$0xff]  ;;  %v858_v41 = vld [vmem:[#allocation23_spill] sm:$0xff]  ;;  %v864_v58 = vld [vmem:[#allocation12_spill] sm:$0xff] }
  0x86   :  { %v101_v3 = vmul.f32 %v450_v13, %v695_v59  ;;  %vm107_vm0 = vweird.f32 %v450_v13  ;;  %v167_v59 = vmul.f32 %v850_v45, %v850_v45  ;;  %v171_v19 = vmul.f32 %v852_v48, %v852_v48  ;;  %v859_v26 = vld [vmem:[#allocation19_spill] sm:$0xff] }
  0x87   :  { %v182_v57 = vadd.f32 %v181_v37, %v143_v34  ;;  %v246_v11 = vadd.f32 %v245_v51, %v150_v31  ;;  %v205_v4 = vadd.f32 %v204_v29, %v152_v33  ;;  %vm108_vm2 = vmor %vm106_vm1, %vm107_vm0  ;;  %v162_v14 = vmul.f32 %v858_v41, %v858_v41  ;;  %v861_v37 = vld [vmem:[#allocation15_spill] sm:$0xff] }
  0x88   :  { %v102_v46 = vmul.f32 %v450_v13, %v101_v3  ;;  %v857_v3 = vld [vmem:[#allocation22_spill] sm:$0xff]  ;;  %v165_v30 = vmul.f32 %v859_v26, %v859_v26  ;;  %v169_v50 = vmul.f32 %v861_v37, %v861_v37  ;;  %v170_v31 = vmul.f32 %v862_v54, %v862_v54  ;;  %v863_v33 = vld [vmem:[#allocation11_spill] sm:$0xff] }
  0x89   :  { %v183_v52 = vadd.f32 %v182_v57, %v147_v63  ;;  %v247_v6 = vadd.f32 %v246_v11, %v154_v27  ;;  %v206_v20 = vadd.f32 %v205_v4, %v712_v16  ;;  %v853_v16 = vld [vmem:[#allocation21_spill] sm:$0xff]  ;;  %v161_v8 = vmul.f32 %v857_v3, %v857_v3 }
  0x8a   :  { %v103_v32 = vmul.f32 0.5, %v102_v46  ;;  %v160_v61 = vmul.f32 %v853_v16, %v853_v16  ;;  %v166_v46 = vmul.f32 %v860_v42, %v860_v42  ;;  %v173_v57 = vmul.f32 %v863_v33, %v863_v33 }
  0x8b   :  { %v184_v24 = vadd.f32 %v183_v52, %v151_v2  ;;  %v248_v21 = vadd.f32 %v247_v6, %v158_v23  ;;  %v851_v2 = vld [vmem:[#allocation24_spill] sm:$0xff]  ;;  %v228_v56 = vadd.f32 %v227_v17, %v161_v8  ;;  %v174_v60 = vmul.f32 %v864_v58, %v864_v58 }
  0x8c   :  { %v104_v28 = vsub.f32 1.5, %v103_v32  ;;  %v207_v34 = vadd.f32 %v206_v20, %v160_v61  ;;  %v388_v42 = vlaneseq }
  0x8d   :  { %v185_v7 = vadd.f32 %v184_v24, %v848_v47  ;;  %v249_v32 = vadd.f32 %v248_v21, %v162_v14  ;;  %v229_v27 = vadd.f32 %v228_v56, %v165_v30 }
  0x8e   :  { %v105_v1 = vmul.f32 %v450_v13, %v104_v28  ;;  %v208_v18 = vadd.f32 %v207_v34, %v164_v39  ;;  %v389_v54 = vand.u32 127, %v388_v42 }
  0x8f   :  { %v186_v12 = vadd.f32 %v185_v7, %v851_v2  ;;  %v250_v5 = vadd.f32 %v249_v32, %v166_v46  ;;  %v230_v28 = vadd.f32 %v229_v27, %v169_v50 }
  0x90   :  { %v109_v15 = vsel %vm108_vm2, %v450_v13, %v105_v1  ;;  %v855_v13 = vld [vmem:[#allocation14_spill] sm:$0xff]  ;;  %v390_v58 = vadd.s32 128, %v389_v54 }
  0x91   :  { %v110_v44 = vmul.f32 %v109_v15, %v849_v43  ;;  %v187_v49 = vadd.f32 %v186_v12, %v163_v10  ;;  %v168_v63 = vmul.f32 %v855_v13, %v855_v13  ;;  %v251_v52 = vadd.f32 %v250_v5, %v170_v31 }
  0x92   :  { %v231_v53 = vadd.f32 %v230_v28, %v173_v57 }
  0x93   :  { %319 = vmatmul.f32.vlgmr.msra.gmra.mxu0 %v110_v44  ;;  %339 = vmatmul.f32.vlgmr.msra.gmra.mxu1 %v110_v44  ;;  %v188_v22 = vadd.f32 %v187_v49, %v167_v59  ;;  %v209_v36 = vadd.f32 %v208_v18, %v168_v63  ;;  %v252_v23 = vadd.f32 %v251_v52, %v174_v60 }
  0x94   :  { %359 = vmatmul.f32.vlgmr.msra.gmra.mxu2 %v110_v44  ;;  %379 = vmatmul.f32.vlgmr.msra.gmra.mxu3 %v110_v44  ;;  %v232_v1 = vrot.slane %v231_v53, 4 }
  0x95   :  { %v189_v38 = vadd.f32 %v188_v22, %v171_v19  ;;  %v210_v55 = vadd.f32 %v209_v36, %v172_v40  ;;  %v253_v4 = vrot.slane %v252_v23, 4 }
  0x96   :  { %v233_v6 = vadd.f32 %v232_v1, %v231_v53 }
  0x97   :  { %v190_v51 = vrot.slane %v189_v38, 4  ;;  %v211_v29 = vrot.slane %v210_v55, 4  ;;  %v254_v10 = vadd.f32 %v253_v4, %v252_v23  ;;  %v391_v4 = vadd.s32 256, %v389_v54 }
  0x98   :  { %v234_v47 = vrot.slane %v233_v6, 2 }
  0x99   :  { %v191_v0 = vadd.f32 %v190_v51, %v189_v38  ;;  %v212_v11 = vadd.f32 %v211_v29, %v210_v55  ;;  %v255_v20 = vrot.slane %v254_v10, 2 }
  0x9a   :  { %v235_v21 = vadd.f32 %v234_v47, %v233_v6 }
  0x9b   :  { %v192_v24 = vrot.slane %v191_v0, 2  ;;  %v213_v25 = vrot.slane %v212_v11, 2  ;;  %v256_v44 = vadd.f32 %v255_v20, %v254_v10  ;;  %v405_v5 = vpop.permute.xlu0 %404 }
  0x9c   :  { %v236_v59 = vrot.slane %v235_v21, 1  ;;  %vm406_vm15 = vcmp.eq.s32.totalorder %v389_v54, %v405_v5  ;;  %vm407_vm0 = vcmp.eq.s32.totalorder %v390_v58, %v405_v5  ;;  %vm408_vm1 = vcmp.eq.s32.totalorder %v391_v4, %v405_v5 }
  0x9d   :  { %v193_v9 = vadd.f32 %v192_v24, %v191_v0  ;;  %v214_v15 = vadd.f32 %v213_v25, %v212_v11  ;;  %v257_v12 = vrot.slane %v256_v44, 1  ;;  %v392_v25 = vadd.s32 384, %v389_v54 }
  0x9e   :  { %v237_v19 = vadd.f32 %v236_v59, %v235_v21 }
  0x9f   :  { %v194_v7 = vrot.slane %v193_v9, 1  ;;  %v215_v17 = vrot.slane %v214_v15, 1  ;;  %v258_v49 = vadd.f32 %v257_v12, %v256_v44  ;;  %vm409_vm2 = vcmp.eq.s32.totalorder %v392_v25, %v405_v5 }
  0xa0   :  { %v261_v22 = vmax.f32 %v237_v19, 1e-24 }
  0xa1   :  { %v195_v43 = vadd.f32 %v194_v7, %v193_v9  ;;  %v216_v45 = vadd.f32 %v215_v17, %v214_v15  ;;  %v262_v38 = vmax.f32 %v258_v49, 1e-24 }
  0xa2   :  { %vm289_vm9 = vweird.f32 %v261_v22 }
  0xa3   :  { %v259_v2 = vmax.f32 %v195_v43, 1e-24  ;;  %v260_v48 = vmax.f32 %v216_v45, 1e-24  ;;  %vm299_vm11 = vweird.f32 %v262_v38 }
  0xa5   :  { %451 = vrsqrt.f32 %v259_v2  ;;  %vm269_vm3 = vweird.f32 %v259_v2  ;;  %vm279_vm5 = vweird.f32 %v260_v48 }
  0xa6   :  { %453 = vrsqrt.f32 %v260_v48 }
  0xa7   :  { %455 = vrsqrt.f32 %v261_v22 }
  0xa8   :  { %457 = vrsqrt.f32 %v262_v38 }
  0xab   :  { %v452_v16 = vpop.eup %451 }
  0xac   :  { %v454_v61 = vpop.eup %453  ;;  %v264_v62 = vmul.f32 %v452_v16, %v259_v2  ;;  %vm270_vm4 = vweird.f32 %v452_v16 }
  0xad   :  { %v274_v39 = vmul.f32 %v454_v61, %v260_v48  ;;  %v456_v13 = vpop.eup %455  ;;  %vm280_vm6 = vweird.f32 %v454_v61  ;;  %vm271_vm7 = vmor %vm269_vm3, %vm270_vm4 }
  0xae   :  { %v458_v63 = vpop.eup %457  ;;  %v265_v34 = vmul.f32 %v452_v16, %v264_v62  ;;  %v284_v40 = vmul.f32 %v456_v13, %v261_v22  ;;  %vm281_vm8 = vmor %vm279_vm5, %vm280_vm6  ;;  %vm290_vm10 = vweird.f32 %v456_v13 }
  0xaf   :  { %v275_v35 = vmul.f32 %v454_v61, %v274_v39  ;;  %v294_v3 = vmul.f32 %v458_v63, %v262_v38  ;;  %vm300_vm12 = vweird.f32 %v458_v63  ;;  %vm794_vm13 = vmor %vm289_vm9, %vm290_vm10 }
  0xb0   :  { %v266_v8 = vmul.f32 0.5, %v265_v34  ;;  %v285_v14 = vmul.f32 %v456_v13, %v284_v40  ;;  %vm798_vm14 = vmor %vm299_vm11, %vm300_vm12 }
  0xb1   :  { %v276_v41 = vmul.f32 0.5, %v275_v35  ;;  %v295_v18 = vmul.f32 %v458_v63, %v294_v3 }
  0xb2   :  { %v267_v26 = vsub.f32 1.5, %v266_v8  ;;  %v286_v46 = vmul.f32 0.5, %v285_v14 }
  0xb3   :  { %v277_v30 = vsub.f32 1.5, %v276_v41  ;;  %v296_v36 = vmul.f32 0.5, %v295_v18 }
  0xb4   :  { %v268_v37 = vmul.f32 %v452_v16, %v267_v26  ;;  %v287_v31 = vsub.f32 1.5, %v286_v46 }
  0xb5   :  { %v278_v50 = vmul.f32 %v454_v61, %v277_v30  ;;  %v297_v55 = vsub.f32 1.5, %v296_v36 }
  0xb6   :  { %v272_v56 = vsel %vm271_vm7, %v452_v16, %v268_v37  ;;  %v288_v51 = vmul.f32 %v456_v13, %v287_v31 }
  0xb7   :  { %v282_v32 = vsel %vm281_vm8, %v454_v61, %v278_v50  ;;  %v298_v52 = vmul.f32 %v458_v63, %v297_v55 }
  0xb8   :  { %v292_v1 = vsel %vm794_vm13, %v456_v13, %v288_v51 }
  0xb9   :  { %v302_v24 = vsel %vm798_vm14, %v458_v63, %v298_v52 }
 0x110   :  { %v320_v33 = vpop.f32.mrf.mxu0  ;;  %v340_v57 = vpop.f32.mrf.mxu1 }
 0x111   :  { %v383_v60 = vmul.f32 %v320_v33, %v272_v56  ;;  %v384_v27 = vmul.f32 %v340_v57, %v282_v32 }
 0x113   :  { %v398_v53 = vmul.f32 64.0, %v383_v60  ;;  %v399_v23 = vmul.f32 64.0, %v384_v27 }
 0x115   :  { %v439_v0 = vadd.f32 -22.4, %v398_v53  ;;  %v440_v11 = vadd.f32 -22.4, %v399_v23 }
 0x117   :  { %v414_v6 = vsel %vm406_vm15, %v439_v0, %v398_v53  ;;  %v415_v9 = vsel %vm407_vm0, %v440_v11, %v399_v23  ;;  %v360_v10 = vpop.f32.mrf.mxu2  ;;  %v380_v15 = vpop.f32.mrf.mxu3 }
 0x118   :  { %418 = vst [vmem:[#allocation5] sm:$0xff] %v414_v6  ;;  %v385_v47 = vmul.f32 %v360_v10, %v292_v1  ;;  %v386_v7 = vmul.f32 %v380_v15, %v302_v24 }
 0x119   :  { %419 = vst [vmem:[#allocation5 + $0x8] sm:$0xff] %v415_v9 }
 0x11a   :  { %v400_v20 = vmul.f32 64.0, %v385_v47  ;;  %v401_v17 = vmul.f32 64.0, %v386_v7 }
 0x11c   :  { %v441_v21 = vadd.f32 -22.4, %v400_v20  ;;  %v442_v43 = vadd.f32 -22.4, %v401_v17 }
 0x11e   :  { %v416_v44 = vsel %vm408_vm1, %v441_v21, %v400_v20  ;;  %v417_v45 = vsel %vm409_vm2, %v442_v43, %v401_v17 }
 0x11f   :  { %420 = vst [vmem:[#allocation5 + $0x10] sm:$0xff] %v416_v44 }
 0x120   :  { %421 = vst [vmem:[#allocation5 + $0x18] sm:$0xff] %v417_v45 }
 0x121   :  { %432 = dma.vmem_to_hbm [thread:$0]  %s428_s21, 512, %s430_s24, [#allocation4]  }
 0x122   :  { %509 = dma.done.wait [#allocation4], 512  }
 0x123   :  { %510 = vsyncadd [#allocation4], 4294966784 }
 0x124   :  { %437 = vsyncpa [#allocation3], 1 }
 0x125   :  { %438 = vsyncpa [#allocation4], 1 }

</bundles_post_ra>
